<compile_context>
chip_gen: v7x
topology: tpu7x:2x2x1
jax: 0.10.0
libtpu: 0.0.40
codegen_flags: <defaults>
</compile_context>

<pallas_src>
import functools

import jax
import jax.numpy as jnp
from jax.experimental import pallas as pl
from jax.experimental.pallas import tpu as pltpu


# --------------------------------------------------------------------------- #
# Kernel
# --------------------------------------------------------------------------- #
def _ffn_kernel(x_ref, w13_ref, w2_ref, o_ref, acc_ref, *, n_k):
    """One (token-tile, hidden-chunk) grid step.

    x_ref:   (tm, dim)      token tile (original dtype), same block across k
    w13_ref: (2, dim, hc)   stacked [w1^T, w3^T] hidden chunk (compute dtype)
    w2_ref:  (hc, dim)      w2^T hidden chunk (compute dtype)
    o_ref:   (tm, dim)      output tile (original dtype)
    acc_ref: (tm, dim) f32  accumulator scratch, resident across k
    """
    cdt = w13_ref.dtype
    x = x_ref[...].astype(cdt)

    # Plain (M,K) x (K,N) MXU dots: weights were pre-transposed at init, so no
    # per-step relayout/transpose of the RHS is required.
    h1 = jnp.dot(x, w13_ref[0], preferred_element_type=jnp.float32)
    h3 = jnp.dot(x, w13_ref[1], preferred_element_type=jnp.float32)

    # SiLU(h1) * h3 in f32 (EUP sigmoid + VPU muls, hidden under MXU work).
    gated = (h1 * jax.nn.sigmoid(h1) * h3).astype(cdt)

    partial = jnp.dot(gated, w2_ref[...], preferred_element_type=jnp.float32)

    if n_k == 1:                       # single hidden chunk: no accumulator
        o_ref[...] = partial.astype(o_ref.dtype)
        return

    k = pl.program_id(1)

    @pl.when(k == 0)
    def _():
        acc_ref[...] = partial

    @pl.when((k > 0) & (k < n_k - 1))
    def _():
        acc_ref[...] += partial

    @pl.when(k == n_k - 1)             # fold the last partial into the store
    def _():
        o_ref[...] = (acc_ref[...] + partial).astype(o_ref.dtype)


# --------------------------------------------------------------------------- #
# Helpers
# --------------------------------------------------------------------------- #
def _round_up(x, m):
    return ((x + m - 1) // m) * m


def _pick_chunk(total, target, step=128):
    """Largest multiple of `step` that divides `total` and is <= target."""
    if total <= target:
        return total
    c = (target // step) * step
    while c >= step:
        if total % c == 0:
            return c
        c -= step
    return total


@functools.lru_cache(maxsize=1)
def _tpu_config():
    """(device_kind, vmem_capacity_bytes, tensorcores/chip, default tm, default hc)."""
    kind = ""
    try:
        kind = jax.devices()[0].device_kind.lower()
    except Exception:
        pass
    try:
        vmem_cap = int(pltpu.get_tpu_info().vmem_capacity_bytes)
    except Exception:
        vmem_cap = (128 << 20) if ("v5" in kind or "v6" in kind) else (64 << 20)
    # TensorCores per chip: v5e / v6e have 1; v4/v5p (megacore) and v7x have 2.
    if "lite" in kind or "v5e" in kind or "v6" in kind:
        n_tc = 1
    elif "v7" in kind or "7x" in kind or "v4" in kind or "v5" in kind:
        n_tc = 2
    else:
        n_tc = 2 if vmem_cap <= (64 << 20) else 1
    # Default tiles: big enough to cross the HBM roofline, sized for VMEM.
    if vmem_cap <= (64 << 20):          # v7x-class: 64 MiB VMEM per TensorCore
        tm_d, hc_d = 384, 512
    elif "v6" in kind:                  # v6e: ~650 flop/byte crossover -> big tm
        tm_d, hc_d = 768, 1024
    else:                               # v5e / other 128-MiB-VMEM parts
        tm_d, hc_d = 512, 1024
    return kind, vmem_cap, n_tc, tm_d, hc_d


def _vmem_estimate(tm, hc, dim, x_item, w_item, o_item):
    """Declared buffers + compiler temporaries, in bytes."""
    b = 0
    b += 2 * tm * dim * x_item           # x tile (double-buffered)
    b += 2 * 2 * dim * hc * w_item       # stacked w1/w3 chunk (double-buffered)
    b += 2 * hc * dim * w_item           # w2 chunk (double-buffered)
    b += 2 * tm * dim * o_item           # output tile (double-buffered)
    b += tm * dim * 4                    # f32 accumulator scratch
    # temporaries: x cast, h1/h3 (f32), gated (f32 + compute copy), partial f32
    b += tm * dim * w_item + 2 * tm * hc * 4 + tm * hc * (4 + w_item) + tm * dim * 4
    return b


def prepare_ffn_weights(w1, w2, w3, *, compute_dtype=jnp.bfloat16):
    """One-time conversion of PyTorch nn.Linear weights to the kernel layout.

    w1, w3: (hidden, dim); w2: (dim, hidden)   [nn.Linear (out, in) layout]

    Returns:
      w13: (2, dim, hidden_pad)  [w1^T, w3^T] stacked, cast to compute_dtype
      w2t: (hidden_pad, dim)     w2^T, zero-padded rows, cast to compute_dtype

    Doing cast / transpose / pad once here (not per forward call) removes the
    per-call f32->bf16 weight pass (~2x the kernel's own weight HBM traffic)
    and any per-step weight transposes inside the kernel.
    """
    hidden, dim = w1.shape
    assert w3.shape == (hidden, dim) and w2.shape == (dim, hidden)
    # Pad hidden so the streamed chunk stays >=256 (>=512 for big layers).
    # Zero padding is numerically exact: silu(0)*0 == 0 and it hits zero w2 rows.
    pad_to = 256 if hidden <= 2048 else 512
    hidden_pad = _round_up(hidden, pad_to)
    pad = hidden_pad - hidden

    def prep_gate(w):                                    # (hidden, dim) -> (dim, hidden_pad)
        wt = jnp.asarray(w).T.astype(compute_dtype)
        return jnp.pad(wt, ((0, 0), (0, pad))) if pad else wt

    w13 = jnp.stack([prep_gate(w1), prep_gate(w3)], axis=0)
    w2t = jnp.asarray(w2).T.astype(compute_dtype)        # (hidden, dim)
    if pad:
        w2t = jnp.pad(w2t, ((0, pad), (0, 0)))
    return w13, w2t


# --------------------------------------------------------------------------- #
# Forward
# --------------------------------------------------------------------------- #
@functools.partial(jax.jit, static_argnames=("tm", "hc"))
def feed_forward(x, w13, w2t, *, tm=None, hc=None):
    """SwiGLU FFN: out = (silu(x @ w1^T) * (x @ w3^T)) @ w2^T.

    x:   (B, S, dim); output keeps x's dtype (accumulation is f32).
    w13: (2, dim, hidden_pad), w2t: (hidden_pad, dim) from prepare_ffn_weights.
    tm:  token-tile override (multiple of 8); hc: hidden-chunk override.
         Defaults are generation-aware (v5e/v6e/v7x).
    """
    B, S, dim = x.shape
    assert w13.shape[0] == 2 and w13.shape[1] == dim
    hidden_pad = w13.shape[2]
    assert w2t.shape == (hidden_pad, dim)
    out_dtype = x.dtype

    _, vmem_cap, n_tc, tm_d, hc_d = _tpu_config()
    tm = tm_d if tm is None else tm
    hc_t = hc_d if hc is None else hc

    # ---- token tiling -------------------------------------------------------
    M = B * S
    M8 = _round_up(M, 8)                     # pad only to the sublane tile
    tm_eff = max(8, min(_round_up(tm, 8), M8))
    # 2-TensorCore chips (v7x / megacore): keep >= 2 blocks on the parallel axis.
    if n_tc >= 2 and M8 >= 512 and pl.cdiv(M8, tm_eff) < 2:
        tm_eff = _round_up(pl.cdiv(M8, 2), 128)
    hc_eff = _pick_chunk(hidden_pad, hc_t)

    # ---- fit tiles into the per-core VMEM budget ----------------------------
    x_item = jnp.dtype(x.dtype).itemsize
    w_item = jnp.dtype(w13.dtype).itemsize
    o_item = jnp.dtype(out_dtype).itemsize
    budget = min(int(vmem_cap * 0.85), vmem_cap - (8 << 20))
    while _vmem_estimate(tm_eff, hc_eff, dim, x_item, w_item, o_item) > budget:
        if tm_eff > 256:
            tm_eff = max(256, tm_eff - 128)
            continue
        smaller = _pick_chunk(hidden_pad, max(128, hc_eff // 2))
        if smaller >= hc_eff:
            break
        hc_eff = smaller

    grid_m = pl.cdiv(M8, tm_eff)
    grid_k = hidden_pad // hc_eff

    # ---- glue: flatten tokens; pad a few rows only if M % 8 != 0 ------------
    # Ragged last token tile (M8 % tm_eff != 0) is handled by Pallas boundary
    # masking: garbage rows only produce garbage rows that are never stored.
    x2d = x.reshape(M, dim)
    if M8 != M:
        x2d = jnp.pad(x2d, ((0, M8 - M), (0, 0)))

    est = _vmem_estimate(tm_eff, hc_eff, dim, x_item, w_item, o_item)
    vmem_limit = int(min(vmem_cap - (2 << 20),
                         max(32 << 20, int(est * 1.25) + (4 << 20))))

    cost = pl.CostEstimate(
        flops=2 * (grid_m * tm_eff) * dim * hidden_pad * 3,
        transcendentals=(grid_m * tm_eff) * hidden_pad,
        bytes_accessed=(M8 * dim * (x_item + o_item)
                        + grid_m * 3 * hidden_pad * dim * w_item),  # weight re-reads
    )

    out2d = pl.pallas_call(
        functools.partial(_ffn_kernel, n_k=grid_k),
        out_shape=jax.ShapeDtypeStruct((M8, dim), out_dtype),
        grid_spec=pltpu.PrefetchScalarGridSpec(
            num_scalar_prefetch=0,
            grid=(grid_m, grid_k),
            in_specs=[
                pl.BlockSpec((tm_eff, dim), lambda i, k: (i, 0)),        # x tile
                pl.BlockSpec((2, dim, hc_eff), lambda i, k: (0, 0, k)),  # w1/w3 chunk
                pl.BlockSpec((hc_eff, dim), lambda i, k: (k, 0)),        # w2^T chunk
            ],
            out_specs=pl.BlockSpec((tm_eff, dim), lambda i, k: (i, 0)),
            scratch_shapes=[pltpu.VMEM((tm_eff, dim), jnp.float32)],
        ),
        compiler_params=pltpu.CompilerParams(
            dimension_semantics=("parallel", "arbitrary"),
            vmem_limit_bytes=vmem_limit,
        ),
        cost_estimate=cost,
    )(x2d, w13, w2t)

    return out2d[:M].reshape(B, S, dim)


def _ref_feed_forward(x, w1, w2, w3):
    """Pure-JAX f32 reference matching the PyTorch forward exactly."""
    h1 = jnp.einsum("bsd,hd->bsh", x, w1)
    h3 = jnp.einsum("bsd,hd->bsh", x, w3)
    gated = jax.nn.silu(h1) * h3
    return jnp.einsum("bsh,dh->bsd", gated, w2)


# --------------------------------------------------------------------------- #
# Demo / self-test
# --------------------------------------------------------------------------- #
if __name__ == "__main__":
    # Module hyperparameters (match FeedForward.__init__ semantics):
    dim = 128
    hidden_dim_arg = 256
    multiple_of = 128
    hidden_dim = int(2 * hidden_dim_arg / 3)
    hidden_dim = multiple_of * ((hidden_dim + multiple_of - 1) // multiple_of)  # -> 256

    B, S = 2, 8

    key = jax.random.PRNGKey(0)
    kx, k1, k2, k3 = jax.random.split(key, 4)

    x = jax.random.normal(kx, (B, S, dim), dtype=jnp.float32)
    # PyTorch nn.Linear weight layout: (out_features, in_features)
    w1 = jax.random.normal(k1, (hidden_dim, dim), dtype=jnp.float32) * 0.02
    w2 = jax.random.normal(k2, (dim, hidden_dim), dtype=jnp.float32) * 0.02
    w3 = jax.random.normal(k3, (hidden_dim, dim), dtype=jnp.float32) * 0.02

    # One-time weight prep (cast to bf16, transpose, pad, stack w1/w3).
    w13, w2t = prepare_ffn_weights(w1, w2, w3)

    ref = _ref_feed_forward(x, w1, w2, w3)

    out = jax.block_until_ready(feed_forward(x, w13, w2t))
    assert out.shape == (B, S, dim)
    # bf16 MXU inputs with f32 accumulation -> compare loosely against f32 ref.
    assert jnp.allclose(out, ref, atol=2e-2, rtol=2e-2), "mismatch vs reference"

    # Stress config: multiple token tiles AND multiple hidden chunks
    # (exercises the accumulator init / accumulate / fold-on-last-step path).
    out_s = jax.block_until_ready(feed_forward(x, w13, w2t, tm=8, hc=128))
    assert jnp.allclose(out_s, ref, atol=2e-2, rtol=2e-2), "mismatch (tiled)"

    # Odd sequence length: exercises the ragged / masked token-tile path.
    x_odd = jax.random.normal(kx, (B, 5, dim), dtype=jnp.float32)
    out_odd = jax.block_until_ready(feed_forward(x_odd, w13, w2t))
    ref_odd = _ref_feed_forward(x_odd, w1, w2, w3)
    assert out_odd.shape == (B, 5, dim)
    assert jnp.allclose(out_odd, ref_odd, atol=2e-2, rtol=2e-2), "mismatch (ragged)"

    print("KERNEL_OK")
</pallas_src>

<mosaic_0001>
module attributes {stable_mosaic.version = 11 : i64} {
  func.func @_ffn_kernel(%arg0: i32, %arg1: i32, %arg2: memref<16x128xf32, #tpu.memory_space<vmem>>, %arg3: memref<2x128x256xbf16, #tpu.memory_space<vmem>>, %arg4: memref<256x128xbf16, #tpu.memory_space<vmem>>, %arg5: memref<16x128xf32, #tpu.memory_space<vmem>>, %arg6: memref<16x128xf32, #tpu.memory_space<vmem>>) attributes {dimension_semantics = [#tpu.dimension_semantics<parallel>, #tpu.dimension_semantics<arbitrary>], iteration_bounds = array<i64: 1, 1>, scalar_prefetch = 0 : i64, scratch_operands = 1 : i64, tpu.core_type = #tpu.core_type<tc>, window_params = [{transform_indices = @transform_0, window_bounds = array<i64: 16, 128>}, {transform_indices = @transform_1, window_bounds = array<i64: 2, 128, 256>}, {transform_indices = @transform_2, window_bounds = array<i64: 256, 128>}, {transform_indices = @transform_3, window_bounds = array<i64: 16, 128>}]} {
    %c0 = arith.constant 0 : index
    %c0_0 = arith.constant 0 : index
    %0 = vector.load %arg2[%c0, %c0_0] : memref<16x128xf32, #tpu.memory_space<vmem>>, vector<16x128xf32>
    %1 = arith.truncf %0 : vector<16x128xf32> to vector<16x128xbf16>
    %c0_1 = arith.constant 0 : index
    %c0_2 = arith.constant 0 : index
    %c0_3 = arith.constant 0 : index
    %2 = vector.load %arg3[%c0_1, %c0_2, %c0_3] : memref<2x128x256xbf16, #tpu.memory_space<vmem>>, vector<1x128x256xbf16>
    %3 = vector.shape_cast %2 : vector<1x128x256xbf16> to vector<128x256xbf16>
    %cst = arith.constant dense<0.000000e+00> : vector<16x256xf32>
    %4 = tpu.matmul %1, %3, %cst {dimension_numbers = #tpu.dot_dimension_numbers<[1], [0], [0], [1], [0, 0, 1, 1], [], []>} : vector<16x128xbf16>, vector<128x256xbf16>, vector<16x256xf32> -> vector<16x256xf32>
    %c1 = arith.constant 1 : index
    %c0_4 = arith.constant 0 : index
    %c0_5 = arith.constant 0 : index
    %5 = vector.load %arg3[%c1, %c0_4, %c0_5] : memref<2x128x256xbf16, #tpu.memory_space<vmem>>, vector<1x128x256xbf16>
    %6 = vector.shape_cast %5 : vector<1x128x256xbf16> to vector<128x256xbf16>
    %cst_6 = arith.constant dense<0.000000e+00> : vector<16x256xf32>
    %7 = tpu.matmul %1, %6, %cst_6 {dimension_numbers = #tpu.dot_dimension_numbers<[1], [0], [0], [1], [0, 0, 1, 1], [], []>} : vector<16x128xbf16>, vector<128x256xbf16>, vector<16x256xf32> -> vector<16x256xf32>
    %8 = arith.negf %4 : vector<16x256xf32>
    %9 = math.exp %8 : vector<16x256xf32>
    %cst_7 = arith.constant 1.000000e+00 : f32
    %10 = vector.broadcast %cst_7 : f32 to vector<16x256xf32>
    %11 = arith.addf %10, %9 : vector<16x256xf32>
    %12 = arith.divf %10, %11 : vector<16x256xf32>
    %13 = arith.mulf %4, %12 : vector<16x256xf32>
    %14 = arith.mulf %13, %7 : vector<16x256xf32>
    %15 = arith.truncf %14 : vector<16x256xf32> to vector<16x256xbf16>
    %c0_8 = arith.constant 0 : index
    %c0_9 = arith.constant 0 : index
    %16 = vector.load %arg4[%c0_8, %c0_9] : memref<256x128xbf16, #tpu.memory_space<vmem>>, vector<256x128xbf16>
    %cst_10 = arith.constant dense<0.000000e+00> : vector<16x128xf32>
    %17 = tpu.matmul %15, %16, %cst_10 {dimension_numbers = #tpu.dot_dimension_numbers<[1], [0], [0], [1], [0, 0, 1, 1], [], []>} : vector<16x256xbf16>, vector<256x128xbf16>, vector<16x128xf32> -> vector<16x128xf32>
    %c0_11 = arith.constant 0 : index
    %c0_12 = arith.constant 0 : index
    %18 = vector.load %arg5[%c0_11, %c0_12] : memref<16x128xf32, #tpu.memory_space<vmem>>, vector<16x128xf32>
    tpu.vector_store %arg5[%c0_11, %c0_12], %17 {strides = array<i32>} : memref<16x128xf32, #tpu.memory_space<vmem>>, vector<16x128xf32>,
    return
  }
  func.func @transform_0(%arg0: i32, %arg1: i32) -> (i32, i32) {
    %c0_i32 = arith.constant 0 : i32
    %c0_i32_0 = arith.constant 0 : i32
    return %arg0, %c0_i32 : i32, i32
  }
  func.func @transform_1(%arg0: i32, %arg1: i32) -> (i32, i32, i32) {
    %c0_i32 = arith.constant 0 : i32
    %c0_i32_0 = arith.constant 0 : i32
    %c0_i32_1 = arith.constant 0 : i32
    return %c0_i32, %c0_i32_0, %arg1 : i32, i32, i32
  }
  func.func @transform_2(%arg0: i32, %arg1: i32) -> (i32, i32) {
    %c0_i32 = arith.constant 0 : i32
    %c0_i32_0 = arith.constant 0 : i32
    return %arg1, %c0_i32 : i32, i32
  }
  func.func @transform_3(%arg0: i32, %arg1: i32) -> (i32, i32) {
    %c0_i32 = arith.constant 0 : i32
    %c0_i32_0 = arith.constant 0 : i32
    return %arg0, %c0_i32 : i32, i32
  }
}

</mosaic_0001>

<bundles_post_ra>
// kernel: feed_forward.1
= control target key start
LH: loop header
LB: loop body
LE: loop exit
PB: predicated region body
PF: predicated region fallthrough
CT: control target
= control target key end

     0   :  { %8 = vsyncpa [#allocation4], 0  ;;  %s912_s0 = inlined_call_operand.hbm [shape: f32[16,128], index: 0, kind: input, shape index: {}]   ;;  %s913_s1 = inlined_call_operand.hbm [shape: bf16[2,128,256], index: 1, kind: input, shape index: {}]   ;;  %s914_s2 = inlined_call_operand.hbm [shape: bf16[256,128], index: 2, kind: input, shape index: {}]   ;;  %s915_s3 = inlined_call_operand.hbm [shape: f32[16,128], index: 3, kind: output, shape index: {}]  }
   0x1   :  { %9 = vsyncpa [#allocation7], 0 }
   0x2   :  { %10 = vsyncpa [#allocation5], 0  ;;  %s819_s12 = smov [#allocation6]   ;;  %s820_s14 = smov [#allocation3]  }
   0x3   :  { %s28_s13 = sshll.u32 %s819_s12, 4  ;;  %s16_s15 = sshll.u32 %s820_s14, 4  ;;  %s29_s13 = int_to_ptr.vmem [resolvable:$true] %s28_s13  ;;  %s848_s15 = int_to_ptr.vmem [resolvable:$true] %s16_s15 }
   0x4   :  { %s725_s18 = scalar_lea.hbm %s913_s1, 4096 }
   0x5   :  { %p726_p0 = scmp.ne.s32.totalorder %s913_s1, %s725_s18  ;;  %p729_p1 = scmp.lt.u32.totalorder %s725_s18, %s913_s1 }
   0x7   :  { %p731_p2 = pnand %p729_p1, %p726_p0 }
   0x9   :  { %734 = shalt.err (!%p731_p2)
}
   0xa   :  { %s735_s23 = scalar_lea.vmem %s29_s13, 4096  ;;  %p740_p4 = scmp.lt.s32.totalorder %s29_s13, %s29_s13 }
   0xb   :  { %p736_p3 = scmp.ne.s32.totalorder %s29_s13, %s735_s23  ;;  %p741_p5 = scmp.lt.s32.totalorder %s735_s23, %s735_s23 }
   0xd   :  { %p742_p6 = por %p741_p5, %p740_p4 }
   0xf   :  { %p743_p7 = pnand %p742_p6, %p736_p3 }
  0x11   :  { %746 = shalt.err (!%p743_p7)
}
  0x12   :  { %s821_s24 = smov 128   ;;  %s822_s25 = smov 8  }
  0x13   :  { %34 = dma.hbm_to_vmem [thread:$0]  %s913_s1, 4096, %s29_s13, [#allocation7], %s821_s24, %s821_s24, %s822_s25  }
  0x14   :  { %s747_s30 = scalar_lea.hbm %s912_s0, 256 }
  0x15   :  { %p748_p8 = scmp.ne.s32.totalorder %s912_s0, %s747_s30  ;;  %p751_p9 = scmp.lt.u32.totalorder %s747_s30, %s912_s0 }
  0x17   :  { %p753_p10 = pnand %p751_p9, %p748_p8 }
  0x19   :  { %756 = shalt.err (!%p753_p10)
}
  0x1a   :  { %s757_s8 = scalar_lea.vmem %s848_s15, 256  ;;  %p762_p12 = scmp.lt.s32.totalorder %s848_s15, %s848_s15 }
  0x1b   :  { %p758_p11 = scmp.ne.s32.totalorder %s848_s15, %s757_s8  ;;  %p763_p13 = scmp.lt.s32.totalorder %s757_s8, %s757_s8 }
  0x1d   :  { %p764_p0 = por %p763_p13, %p762_p12 }
  0x1f   :  { %p765_p1 = pnand %p764_p0, %p758_p11 }
  0x21   :  { %768 = shalt.err (!%p765_p1)
}
  0x22   :  { %22 = dma.hbm_to_vmem [thread:$0]  %s912_s0, 256, %s848_s15, [#allocation4], %s821_s24, %s821_s24, %s822_s25  }
  0x23   :  { %s823_s10 = smov [#allocation8]   ;;  %s769_s14 = scalar_lea.hbm %s914_s2, 2048 }
  0x24   :  { %s40_s11 = sshll.u32 %s823_s10, 4  ;;  %p770_p2 = scmp.ne.s32.totalorder %s914_s2, %s769_s14  ;;  %s41_s11 = int_to_ptr.vmem [resolvable:$true] %s40_s11 }
  0x25   :  { %p773_p3 = scmp.lt.u32.totalorder %s769_s14, %s914_s2 }
  0x27   :  { %p775_p4 = pnand %p773_p3, %p770_p2 }
  0x29   :  { %778 = shalt.err (!%p775_p4)
}
  0x2a   :  { %s779_s20 = scalar_lea.vmem %s41_s11, 2048  ;;  %p784_p6 = scmp.lt.s32.totalorder %s41_s11, %s41_s11 }
  0x2b   :  { %p780_p5 = scmp.ne.s32.totalorder %s41_s11, %s779_s20  ;;  %p785_p7 = scmp.lt.s32.totalorder %s779_s20, %s779_s20 }
  0x2d   :  { %p786_p8 = por %p785_p7, %p784_p6 }
  0x2f   :  { %p787_p9 = pnand %p786_p8, %p780_p5 }
  0x31   :  { %790 = shalt.err (!%p787_p9)
}
  0x32   :  { %s824_s0 = smov 64   ;;  %s825_s15 = smov 4  }
  0x33   :  { %46 = dma.hbm_to_vmem [thread:$0]  %s914_s2, 2048, %s41_s11, [#allocation7], %s824_s0, %s824_s0, %s825_s15  }
  0x34   :  { %813 = dma.done.wait [#allocation4], 256  }
  0x35   :  { %814 = vsyncadd [#allocation4], 4294967040 }
  0x36   :  { %815 = dma.done.wait [#allocation7], 6144  }
  0x37   :  { %816 = vsyncadd [#allocation7], 4294961152  ;;  %v826_v0 = vmov 0   ;;  %v645_v1 = vld [vmem:[#allocation6 + $0x4] ss:$8 sps:$4 sm:$0xff]   ;;  %v57_v28 = vld [vmem:[#allocation3] sm:$0xff] }
  0x38   :  { %188 = vmatprep.mubr.bf16.mxu0 %v826_v0  ;;  %328 = vmatprep.mubr.bf16.mxu1 %v826_v0  ;;  %v647_v2 = vld [vmem:[#allocation6] ss:$8 sps:$4 sm:$0xff]   ;;  %v648_v3 = vld [vmem:[#allocation6 + $0x14] ss:$8 sps:$4 sm:$0xff]   ;;  %v650_v4 = vld [vmem:[#allocation6 + $0x10] ss:$8 sps:$4 sm:$0xff]  }
  0x39   :  { %156 = vmatprep.subr.bf16.mxu0 %v645_v1  ;;  %v651_v5 = vld [vmem:[#allocation6 + $0x24] ss:$8 sps:$4 sm:$0xff]   ;;  %v653_v6 = vld [vmem:[#allocation6 + $0x20] ss:$8 sps:$4 sm:$0xff]   ;;  %v654_v7 = vld [vmem:[#allocation6 + $0x34] ss:$8 sps:$4 sm:$0xff]  }
  0x3a   :  { %157 = vmatpush1.bf16.msra.mxu0 %v647_v2  ;;  %v666_v8 = vld [vmem:[#allocation6 + $0x84] ss:$8 sps:$4 sm:$0xff]   ;;  %v668_v9 = vld [vmem:[#allocation6 + $0x80] ss:$8 sps:$4 sm:$0xff]   ;;  %v656_v10 = vld [vmem:[#allocation6 + $0x30] ss:$8 sps:$4 sm:$0xff]  }
  0x3b   :  { %158 = vmatprep.subr.bf16.mxu0 %v648_v3  ;;  %v657_v11 = vld [vmem:[#allocation6 + $0x44] ss:$8 sps:$4 sm:$0xff]   ;;  %296 = vmatprep.subr.bf16.mxu1 %v666_v8  ;;  %v672_v12 = vld [vmem:[#allocation6 + $0x94] ss:$8 sps:$4 sm:$0xff]   ;;  %v674_v13 = vld [vmem:[#allocation6 + $0x90] ss:$8 sps:$4 sm:$0xff]  }
  0x3c   :  { %297 = vmatpush1.bf16.msra.mxu1 %v668_v9  ;;  %v675_v14 = vld [vmem:[#allocation6 + $0xa4] ss:$8 sps:$4 sm:$0xff]   ;;  %v659_v15 = vld [vmem:[#allocation6 + $0x40] ss:$8 sps:$4 sm:$0xff]   ;;  %v660_v16 = vld [vmem:[#allocation6 + $0x54] ss:$8 sps:$4 sm:$0xff]  }
  0x3d   :  { %298 = vmatprep.subr.bf16.mxu1 %v672_v12  ;;  %v677_v17 = vld [vmem:[#allocation6 + $0xa0] ss:$8 sps:$4 sm:$0xff]   ;;  %v678_v18 = vld [vmem:[#allocation6 + $0xb4] ss:$8 sps:$4 sm:$0xff]   ;;  %v662_v19 = vld [vmem:[#allocation6 + $0x50] ss:$8 sps:$4 sm:$0xff]  }
  0x3e   :  { %159 = vmatpush1.bf16.msra.mxu0 %v650_v4  ;;  %v663_v20 = vld [vmem:[#allocation6 + $0x64] ss:$8 sps:$4 sm:$0xff]   ;;  %v665_v21 = vld [vmem:[#allocation6 + $0x60] ss:$8 sps:$4 sm:$0xff]   ;;  %v680_v22 = vld [vmem:[#allocation6 + $0xb0] ss:$8 sps:$4 sm:$0xff]  }
  0x3f   :  { %160 = vmatprep.subr.bf16.mxu0 %v651_v5  ;;  %v681_v23 = vld [vmem:[#allocation6 + $0xc4] ss:$8 sps:$4 sm:$0xff]   ;;  %v669_v24 = vld [vmem:[#allocation6 + $0x74] ss:$8 sps:$4 sm:$0xff]   ;;  %v683_v25 = vld [vmem:[#allocation6 + $0xc0] ss:$8 sps:$4 sm:$0xff]  }
  0x40   :  { %299 = vmatpush1.bf16.msra.mxu1 %v674_v13  ;;  %v684_v26 = vld [vmem:[#allocation6 + $0xd4] ss:$8 sps:$4 sm:$0xff]   ;;  %v671_v27 = vld [vmem:[#allocation6 + $0x70] ss:$8 sps:$4 sm:$0xff]   ;;  %v687_v31 = vld [vmem:[#allocation6 + $0xe4] ss:$8 sps:$4 sm:$0xff]  }
  0x41   :  { %300 = vmatprep.subr.bf16.mxu1 %v675_v14  ;;  %v58_v29 = vld [vmem:[#allocation3 + $0x8] sm:$0xff]  ;;  %v689_v33 = vld [vmem:[#allocation6 + $0xe0] ss:$8 sps:$4 sm:$0xff]   ;;  %v697_v40 = vld [vmem:[#allocation8 + $0x50] sm:$0xff]   ;;  %s827_s2 = smov [#allocation9]  }
  0x42   :  { %161 = vmatpush1.bf16.msra.mxu0 %v653_v6  ;;  %v686_v30 = vld [vmem:[#allocation6 + $0xd0] ss:$8 sps:$4 sm:$0xff]   ;;  %v59_v32 = vpack.c.bf16 %v58_v29, %v57_v28  ;;  %v690_v34 = vld [vmem:[#allocation6 + $0xf4] ss:$8 sps:$4 sm:$0xff]   ;;  %v693_v36 = vld [vmem:[#allocation8 + $0x40] sm:$0xff]   ;;  %s549_s23 = sshll.u32 %s827_s2, 4  ;;  %s550_s23 = int_to_ptr.vmem [resolvable:$true] %s549_s23 }
  0x43   :  { %162 = vmatprep.subr.bf16.mxu0 %v654_v7  ;;  %v692_v35 = vld [vmem:[#allocation6 + $0xf0] ss:$8 sps:$4 sm:$0xff]   ;;  %v694_v37 = vld [vmem:[#allocation8] sm:$0xff]   ;;  %v695_v38 = vld [vmem:[#allocation8 + $0x48] sm:$0xff]   ;;  %s791_s26 = scalar_lea.vmem %s550_s23, 256  ;;  %p796_p11 = scmp.lt.s32.totalorder %s550_s23, %s550_s23 }
  0x44   :  { %301 = vmatpush1.bf16.msra.mxu1 %v677_v17  ;;  %v696_v39 = vld [vmem:[#allocation8 + $0x8] sm:$0xff]   ;;  %v698_v41 = vld [vmem:[#allocation8 + $0x10] sm:$0xff]   ;;  %v699_v42 = vld [vmem:[#allocation8 + $0x58] sm:$0xff]   ;;  %p792_p10 = scmp.ne.s32.totalorder %s550_s23, %s791_s26  ;;  %p797_p12 = scmp.lt.s32.totalorder %s791_s26, %s791_s26 }
  0x45   :  { %302 = vmatprep.subr.bf16.mxu1 %v678_v18  ;;  %v700_v43 = vld [vmem:[#allocation8 + $0x18] sm:$0xff]   ;;  %v701_v44 = vld [vmem:[#allocation8 + $0x60] sm:$0xff]   ;;  %v703_v46 = vld [vmem:[#allocation8 + $0x68] sm:$0xff]  }
  0x46   :  { %163 = vmatpush1.bf16.msra.mxu0 %v656_v10  ;;  %v702_v45 = vld [vmem:[#allocation8 + $0x20] sm:$0xff]   ;;  %v704_v47 = vld [vmem:[#allocation8 + $0x28] sm:$0xff]   ;;  %v705_v48 = vld [vmem:[#allocation8 + $0x70] sm:$0xff]   ;;  %p798_p13 = por %p797_p12, %p796_p11 }
  0x47   :  { %164 = vmatprep.subr.bf16.mxu0 %v657_v11  ;;  %v706_v49 = vld [vmem:[#allocation8 + $0x30] sm:$0xff]   ;;  %v707_v50 = vld [vmem:[#allocation8 + $0x78] sm:$0xff]  }
  0x48   :  { %303 = vmatpush1.bf16.msra.mxu1 %v680_v22  ;;  %v708_v51 = vld [vmem:[#allocation8 + $0x38] sm:$0xff]   ;;  %p799_p0 = pnand %p798_p13, %p792_p10 }
  0x49   :  { %304 = vmatprep.subr.bf16.mxu1 %v681_v23 }
  0x4a   :  { %165 = vmatpush1.bf16.msra.mxu0 %v659_v15 }
  0x4b   :  { %166 = vmatprep.subr.bf16.mxu0 %v660_v16 }
  0x4c   :  { %305 = vmatpush1.bf16.msra.mxu1 %v683_v25 }
  0x4d   :  { %306 = vmatprep.subr.bf16.mxu1 %v684_v26 }
  0x4e   :  { %167 = vmatpush1.bf16.msra.mxu0 %v662_v19 }
  0x4f   :  { %168 = vmatprep.subr.bf16.mxu0 %v663_v20 }
  0x50   :  { %307 = vmatpush1.bf16.msra.mxu1 %v686_v30 }
  0x51   :  { %308 = vmatprep.subr.bf16.mxu1 %v687_v31 }
  0x52   :  { %169 = vmatpush1.bf16.msra.mxu0 %v665_v21 }
  0x53   :  { %170 = vmatprep.subr.bf16.mxu0 %v669_v24 }
  0x54   :  { %309 = vmatpush1.bf16.msra.mxu1 %v689_v33 }
  0x55   :  { %310 = vmatprep.subr.bf16.mxu1 %v690_v34 }
  0x56   :  { %171 = vmatpush1.bf16.msra.mxu0 %v671_v27 }
  0x57   :  { %614 = vmatprep.subr.bf16.mxu0 %v693_v36 }
  0x58   :  { %311 = vmatpush1.bf16.msra.mxu1 %v692_v35 }
  0x59   :  { %189 = vmatmul.mubr.bf16.vlgmr.msra.gmra.mrb[0].mxu0 %v59_v32 }
  0x5a   :  { %615 = vmatpush3.bf16.msra.mxu0 %v694_v37 }
  0x5b   :  { %329 = vmatmul.mubr.bf16.vlgmr.msra.gmra.mrb[0].mxu1 %v59_v32  ;;  %616 = vmatprep.subr.bf16.mxu0 %v695_v38 }
  0x5e   :  { %617 = vmatpush3.bf16.msra.mxu0 %v696_v39 }
  0x5f   :  { %618 = vmatprep.subr.bf16.mxu0 %v697_v40 }
  0x62   :  { %619 = vmatpush3.bf16.msra.mxu0 %v698_v41 }
  0x63   :  { %620 = vmatprep.subr.bf16.mxu0 %v699_v42 }
  0x66   :  { %621 = vmatpush3.bf16.msra.mxu0 %v700_v43 }
  0x67   :  { %622 = vmatprep.subr.bf16.mxu0 %v701_v44 }
  0x6a   :  { %623 = vmatpush3.bf16.msra.mxu0 %v702_v45 }
  0x6b   :  { %624 = vmatprep.subr.bf16.mxu0 %v703_v46 }
  0x6e   :  { %625 = vmatpush3.bf16.msra.mxu0 %v704_v47 }
  0x6f   :  { %626 = vmatprep.subr.bf16.mxu0 %v705_v48 }
  0x72   :  { %627 = vmatpush3.bf16.msra.mxu0 %v706_v49 }
  0x73   :  { %628 = vmatprep.subr.bf16.mxu0 %v707_v50 }
  0x76   :  { %629 = vmatpush3.bf16.msra.mxu0 %v708_v51 }
 0x12c   :  { %v190_v52 = vpop.f32.mrb[0].mxu0 }
 0x12d   :  { %v594_v53 = vmul.f32 -1.442695, %v190_v52  ;;  %v192_v54 = vpop.f32.mrb[1].mxu0 }
 0x12e   :  { %v595_v55 = vmul.f32 -1.442695, %v192_v54  ;;  %v194_v56 = vpop.f32.mrb[2].mxu0  ;;  %v330_v60 = vpop.f32.mrb[0].mxu1 }
 0x12f   :  { %709 = vpow2.f32 %v594_v53  ;;  %v596_v57 = vmul.f32 -1.442695, %v194_v56  ;;  %v196_v58 = vpop.f32.mrb[3].mxu0  ;;  %v332_v61 = vpop.f32.mrb[1].mxu1 }
 0x130   :  { %711 = vpow2.f32 %v595_v55  ;;  %v597_v59 = vmul.f32 -1.442695, %v196_v58  ;;  %v334_v62 = vpop.f32.mrb[2].mxu1 }
 0x131   :  { %713 = vpow2.f32 %v596_v57  ;;  %v336_v0 = vpop.f32.mrb[3].mxu1 }
 0x132   :  { %715 = vpow2.f32 %v597_v59 }
 0x139   :  { %v710_v63 = vpop.eup %709 }
 0x13a   :  { %v712_v1 = vpop.eup %711  ;;  %v351_v2 = vadd.f32 1.0, %v710_v63 }
 0x13b   :  { %v714_v3 = vpop.eup %713  ;;  %v352_v4 = vadd.f32 1.0, %v712_v1 }
 0x13c   :  { %v716_v5 = vpop.eup %715  ;;  %717 = vrcp.f32 %v351_v2  ;;  %v353_v6 = vadd.f32 1.0, %v714_v3 }
 0x13d   :  { %719 = vrcp.f32 %v352_v4  ;;  %v354_v7 = vadd.f32 1.0, %v716_v5 }
 0x13e   :  { %721 = vrcp.f32 %v353_v6 }
 0x13f   :  { %723 = vrcp.f32 %v354_v7 }
 0x146   :  { %v718_v8 = vpop.eup %717 }
 0x147   :  { %v720_v9 = vpop.eup %719  ;;  %v363_v10 = vmul.f32 %v718_v8, %v190_v52 }
 0x148   :  { %v722_v11 = vpop.eup %721  ;;  %v364_v12 = vmul.f32 %v720_v9, %v192_v54 }
 0x149   :  { %v724_v13 = vpop.eup %723  ;;  %v365_v14 = vmul.f32 %v722_v11, %v194_v56  ;;  %v367_v15 = vmul.f32 %v363_v10, %v330_v60 }
 0x14a   :  { %v366_v16 = vmul.f32 %v724_v13, %v196_v58  ;;  %v368_v17 = vmul.f32 %v364_v12, %v332_v61 }
 0x14b   :  { %v369_v18 = vmul.f32 %v365_v14, %v334_v62 }
 0x14c   :  { %v370_v19 = vmul.f32 %v366_v16, %v336_v0 }
 0x14d   :  { %v371_v20 = vpack.c.bf16 %v369_v18, %v367_v15 }
 0x14e   :  { %v372_v21 = vpack.c.bf16 %v370_v19, %v368_v17 }
 0x150   :  { %533 = vmatprep.mubr.bf16.mxu0 %v372_v21 }
 0x151   :  { %534 = vmatmul.mubr.bf16.vlgmr.msra.gmra.mrb[4].mxu0 %v371_v20 }
 0x224   :  { %v630_v22 = vpop.f32.mrb[4].mxu0 }
 0x225   :  { %v631_v23 = vpop.f32.mrb[5].mxu0 }
 0x226   :  { %v632_v24 = vadd.f32 %v631_v23, %v630_v22  ;;  %v633_v25 = vpop.f32.mrb[6].mxu0 }
 0x227   :  { %v634_v26 = vpop.f32.mrb[7].mxu0 }
 0x228   :  { %542 = vst [vmem:[#allocation9] sm:$0xff] %v632_v24  ;;  %v635_v27 = vadd.f32 %v634_v26, %v633_v25 }
 0x22a   :  { %543 = vst [vmem:[#allocation9 + $0x8] sm:$0xff] %v635_v27 }
 0x22b   :  { %802 = shalt.err (!%p799_p0)
}
 0x22c   :  { %s803_s29 = scalar_lea.hbm %s915_s3, 256 }
 0x22d   :  { %p804_p1 = scmp.ne.s32.totalorder %s915_s3, %s803_s29  ;;  %p807_p2 = scmp.lt.u32.totalorder %s803_s29, %s915_s3 }
 0x22f   :  { %p809_p3 = pnand %p807_p2, %p804_p1 }
 0x231   :  { %812 = shalt.err (!%p809_p3)
}
 0x232   :  { %555 = dma.vmem_to_hbm [thread:$0]  %s550_s23, 256, %s915_s3, [#allocation5], %s821_s24, %s821_s24, %s822_s25  }
 0x233   :  { %817 = dma.done.wait [#allocation5], 256  }
 0x234   :  { %818 = vsyncadd [#allocation5], 4294967040 }
 0x235   :  { %559 = vsyncpa [#allocation4], 1 }
 0x236   :  { %560 = vsyncpa [#allocation7], 1 }
 0x237   :  { %561 = vsyncpa [#allocation5], 1 }

</bundles_post_ra>
